<compile_context>
chip_gen: v7x
topology: tpu7x:2x2x1
jax: 0.10.0
libtpu: 0.0.40
codegen_flags: <defaults>
</compile_context>

<pallas_src>
import jax
import jax.numpy as jnp
from jax.experimental import pallas as pl
from jax.experimental.pallas import tpu as pltpu


def _make_attention_kernel(H, W):
    HW = H * W

    def kernel(x_ref, w1t_ref, b1_ref, w2_ref, b2_ref, mask_ref, cw_ref, o_ref):
        # x_ref: (Nb, C, HW) VMEM.  w1t_ref: (C, Cr), b1_ref: (1, Cr),
        # w2_ref: (C, Cr), b2_ref: (C, 1), mask_ref: (9, HW) — all VMEM,
        # constant block index (fetched once, resident across grid steps).
        # cw_ref: (18,) SMEM = [9 avg-channel weights | 9 max-channel weights].
        nb, C, _ = x_ref.shape
        x = x_ref[...].astype(jnp.float32)                       # (Nb, C, HW)

        # ---- fused channel-attention MLP (no MXU: ~64 MACs / image) --------
        y = jnp.sum(x, axis=2, keepdims=True) * jnp.float32(1.0 / HW)   # (Nb, C, 1)
        w1t = w1t_ref[...]                                                # (C, Cr)
        h = jnp.sum(y * w1t[None, :, :], axis=1, keepdims=True)          # (Nb, 1, Cr)
        h = jnp.maximum(h + b1_ref[...][None, :, :], 0.0)
        w2 = w2_ref[...]                                                  # (C, Cr)
        s_pre = jnp.sum(h * w2[None, :, :], axis=2, keepdims=True)       # (Nb, C, 1)
        s = jax.nn.sigmoid(s_pre + b2_ref[...][None, :, :])              # (Nb, C, 1)

        # ---- spatial statistics of the channel-scaled features -------------
        xs = x * s                                        # not kept live past the reduces
        inv_c = jnp.float32(1.0 / C)
        avg_out = jnp.sum(xs, axis=1) * inv_c             # (Nb, HW) sublane reduce
        max_out = jnp.max(xs, axis=1)                     # (Nb, HW)
        stacked = jnp.concatenate([avg_out, max_out], axis=0)   # (2*Nb, HW)

        # Per-row selector: first Nb rows take the avg-channel weight, last Nb
        # rows the max-channel weight (arithmetic blend — no vselect needed).
        half_f = (jax.lax.broadcasted_iota(jnp.int32, (2 * nb, 1), 0)
                  < nb).astype(jnp.float32)               # (2*Nb, 1)

        w_avg = [cw_ref[k] for k in range(9)]             # SMEM scalar reads
        w_max = [cw_ref[9 + k] for k in range(9)]

        # 3x3 'SAME' conv over [avg; max] via lane rotations (XLU) + precomputed
        # boundary masks: one roll, one mask mul, one FMA per tap.
        acc2 = jnp.zeros((2 * nb, HW), jnp.float32)
        for ki in range(3):
            for kj in range(3):
                k = ki * 3 + kj
                off = (ki - 1) * W + (kj - 1)             # spatial offset of this tap
                if off == 0:
                    t = stacked
                else:
                    t = pltpu.roll(stacked, (-off) % HW, axis=1)   # lane p reads p+off
                    t = t * mask_ref[k:k + 1, :]          # zero wrapped / padded taps
                wcol = w_max[k] + (w_avg[k] - w_max[k]) * half_f   # (2*Nb, 1)
                acc2 = acc2 + wcol * t

        acc = acc2[:nb, :] + acc2[nb:, :]                 # (Nb, HW) fold avg+max halves
        # sigmoid in explicit exp/reciprocal form (EUP-friendly).
        z = pl.reciprocal(1.0 + jnp.exp(-acc), approx=False)

        # Recompute xs from a fresh load so it is not live across the tap loop.
        xs2 = x_ref[...].astype(jnp.float32) * s
        o_ref[...] = (z[:, None, :] * xs2).astype(o_ref.dtype)

    return kernel


def _pick_block_n(n, c, hw, itemsize, max_block_bytes=1 << 20):
    """Largest divisor of n whose x-block stays under ~1 MiB.

    No forced minimum step count: on single-TC chips (v5e/v6e) the grid is a
    sequential loop, so extra steps are pure ~0.35us overhead.  Large n
    naturally yields multiple big parallel-sharded steps for v7x's two cores,
    and the byte cap keeps in/out double-buffers + in-kernel temporaries well
    inside every generation's default scoped-VMEM limit.
    """
    per_img = max(1, c * hw * itemsize)
    cap = max(1, max_block_bytes // per_img)
    nb = 1
    for d in range(1, min(n, cap) + 1):
        if n % d == 0:
            nb = d
    return nb


def attention_forward(x, w1, b1, w2, b2, conv_w):
    """x: (N, C, H, W) NCHW like the PyTorch module.
    w1: (C//8, C), b1: (C//8,), w2: (C, C//8), b2: (C,), conv_w: (1, 2, 3, 3)."""
    N, C, H, W = x.shape
    HW = H * W
    Cr = w1.shape[0]

    x_flat = x.reshape(N, C, HW)                           # lane-dense HW

    # Small MLP params, pre-oriented so the kernel never needs a lane<->sublane
    # transpose: contract over C on the sublane axis, over Cr on the lane axis.
    w1t = jnp.asarray(w1, jnp.float32).T                   # (C, Cr)
    b1r = jnp.asarray(b1, jnp.float32).reshape(1, Cr)
    w2r = jnp.asarray(w2, jnp.float32)                     # (C, Cr)
    b2r = jnp.asarray(b2, jnp.float32).reshape(C, 1)
    cw = jnp.asarray(conv_w, jnp.float32).reshape(-1)      # (18,) [avg 9 | max 9]

    # (9, HW) validity mask for the 3x3 'SAME' conv taps (1.0 where the tap's
    # source pixel is in-bounds), built once at trace time.
    lane = jnp.arange(HW, dtype=jnp.int32)
    row, col = lane // W, lane % W
    tap_masks = []
    for ki in range(3):
        for kj in range(3):
            oi, oj = ki - 1, kj - 1
            ok = jnp.ones((HW,), jnp.bool_)
            if oi == -1:
                ok = ok & (row >= 1)
            if oi == 1:
                ok = ok & (row <= H - 2)
            if oj == -1:
                ok = ok & (col >= 1)
            if oj == 1:
                ok = ok & (col <= W - 2)
            tap_masks.append(ok.astype(jnp.float32))
    tap_mask = jnp.stack(tap_masks, axis=0)                # (9, HW)

    nb = _pick_block_n(N, C, HW, jnp.dtype(x.dtype).itemsize)
    grid = (N // nb,)
    kernel = _make_attention_kernel(H, W)

    out = pl.pallas_call(
        kernel,
        out_shape=jax.ShapeDtypeStruct((N, C, HW), x.dtype),
        grid_spec=pltpu.PrefetchScalarGridSpec(
            num_scalar_prefetch=0,
            grid=grid,
            in_specs=[
                pl.BlockSpec((nb, C, HW), lambda i: (i, 0, 0)),   # x
                pl.BlockSpec((C, Cr), lambda i: (0, 0)),          # w1.T
                pl.BlockSpec((1, Cr), lambda i: (0, 0)),          # b1
                pl.BlockSpec((C, Cr), lambda i: (0, 0)),          # w2
                pl.BlockSpec((C, 1), lambda i: (0, 0)),           # b2
                pl.BlockSpec((9, HW), lambda i: (0, 0)),          # tap masks
                pl.BlockSpec(memory_space=pltpu.MemorySpace.SMEM),  # conv weights
            ],
            out_specs=pl.BlockSpec((nb, C, HW), lambda i: (i, 0, 0)),
        ),
        compiler_params=pltpu.CompilerParams(
            dimension_semantics=("parallel",)),
    )(x_flat, w1t, b1r, w2r, b2r, tap_mask, cw)
    return out.reshape(N, C, H, W)


def attention_ref(x, w1, b1, w2, b2, conv_w):
    """Pure-JAX NCHW reference mirroring the PyTorch forward."""
    y = jnp.mean(x, axis=(2, 3))                                 # (N, C)
    h = jnp.maximum(y @ w1.T + b1, 0.0)                          # (N, C//8)
    s = jax.nn.sigmoid(h @ w2.T + b2)                            # (N, C)
    xs = x * s[:, :, None, None]
    avg_out = jnp.mean(xs, axis=1, keepdims=True)                # (N,1,H,W)
    max_out = jnp.max(xs, axis=1, keepdims=True)
    z2 = jnp.concatenate([avg_out, max_out], axis=1)             # (N,2,H,W)
    z = jax.lax.conv_general_dilated(
        z2, conv_w, (1, 1), "SAME",
        dimension_numbers=("NCHW", "OIHW", "NCHW"))
    z = jax.nn.sigmoid(z)
    return z * xs


if __name__ == "__main__":
    N, C, H, W = 2, 16, 16, 16        # channel=16 -> channel//8 = 2
    Cr = C // 8

    key = jax.random.PRNGKey(0)
    kx, k1, kb1, k2, kb2, kc = jax.random.split(key, 6)
    x = jax.random.normal(kx, (N, C, H, W), jnp.float32)
    w1 = jax.random.normal(k1, (Cr, C), jnp.float32) * 0.2    # Conv2d(C, C//8, 1) weight
    b1 = jax.random.normal(kb1, (Cr,), jnp.float32) * 0.1
    w2 = jax.random.normal(k2, (C, Cr), jnp.float32) * 0.2    # Conv2d(C//8, C, 1) weight
    b2 = jax.random.normal(kb2, (C,), jnp.float32) * 0.1
    conv_w = jax.random.normal(kc, (1, 2, 3, 3), jnp.float32) * 0.3  # Conv2d(2,1,3) weight

    out = attention_forward(x, w1, b1, w2, b2, conv_w)
    out = jax.block_until_ready(out)

    ref = attention_ref(x, w1, b1, w2, b2, conv_w)
    assert out.shape == (N, C, H, W)
    assert jnp.allclose(out, ref, rtol=1e-4, atol=1e-4), "mismatch vs reference"

    print("KERNEL_OK")
</pallas_src>

<mosaic_0001>
module attributes {stable_mosaic.version = 11 : i64} {
  func.func @kernel(%arg0: i32, %arg1: memref<2x16x256xf32, #tpu.memory_space<vmem>>, %arg2: memref<16x2xf32, #tpu.memory_space<vmem>>, %arg3: memref<1x2xf32, #tpu.memory_space<vmem>>, %arg4: memref<16x2xf32, #tpu.memory_space<vmem>>, %arg5: memref<16x1xf32, #tpu.memory_space<vmem>>, %arg6: memref<9x256xf32, #tpu.memory_space<vmem>>, %arg7: memref<18xf32, #tpu.memory_space<smem>>, %arg8: memref<2x16x256xf32, #tpu.memory_space<vmem>>) attributes {dimension_semantics = [#tpu.dimension_semantics<parallel>], iteration_bounds = array<i64: 1>, scalar_prefetch = 0 : i64, scratch_operands = 0 : i64, tpu.core_type = #tpu.core_type<tc>, window_params = [{transform_indices = @transform_0, window_bounds = array<i64: 2, 16, 256>}, {pipeline_mode = #tpu.pipeline_mode<synchronous>, transform_indices = @transform_1, window_bounds = array<i64: 16, 2>}, {pipeline_mode = #tpu.pipeline_mode<synchronous>, transform_indices = @transform_2, window_bounds = array<i64: 1, 2>}, {pipeline_mode = #tpu.pipeline_mode<synchronous>, transform_indices = @transform_3, window_bounds = array<i64: 16, 2>}, {pipeline_mode = #tpu.pipeline_mode<synchronous>, transform_indices = @transform_4, window_bounds = array<i64: 16, 1>}, {pipeline_mode = #tpu.pipeline_mode<synchronous>, transform_indices = @transform_5, window_bounds = array<i64: 9, 256>}, {transform_indices = @transform_6, window_bounds = array<i64: 18>}, {transform_indices = @transform_7, window_bounds = array<i64: 2, 16, 256>}]} {
    %c0 = arith.constant 0 : index
    %c0_0 = arith.constant 0 : index
    %c0_1 = arith.constant 0 : index
    %0 = vector.load %arg1[%c0, %c0_0, %c0_1] : memref<2x16x256xf32, #tpu.memory_space<vmem>>, vector<2x16x256xf32>
    %cst = arith.constant dense<0.000000e+00> : vector<2x16xf32>
    %1 = vector.multi_reduction <add>, %0, %cst [2] : vector<2x16x256xf32> to vector<2x16xf32>
    %2 = vector.shape_cast %1 : vector<2x16xf32> to vector<2x16x1xf32>
    %cst_2 = arith.constant 3.906250e-03 : f32
    %3 = vector.broadcast %cst_2 : f32 to vector<2x16x1xf32>
    %4 = arith.mulf %2, %3 : vector<2x16x1xf32>
    %c0_3 = arith.constant 0 : index
    %c0_4 = arith.constant 0 : index
    %5 = vector.load %arg2[%c0_3, %c0_4] : memref<16x2xf32, #tpu.memory_space<vmem>>, vector<16x2xf32>
    %6 = vector.shape_cast %5 : vector<16x2xf32> to vector<1x16x2xf32>
    %7 = vector.broadcast %4 : vector<2x16x1xf32> to vector<2x16x2xf32>
    %8 = vector.broadcast %6 : vector<1x16x2xf32> to vector<2x16x2xf32>
    %9 = arith.mulf %7, %8 : vector<2x16x2xf32>
    %cst_5 = arith.constant dense<0.000000e+00> : vector<2x2xf32>
    %10 = vector.multi_reduction <add>, %9, %cst_5 [1] : vector<2x16x2xf32> to vector<2x2xf32>
    %11 = vector.shape_cast %10 : vector<2x2xf32> to vector<2x1x2xf32>
    %c0_6 = arith.constant 0 : index
    %c0_7 = arith.constant 0 : index
    %12 = vector.load %arg3[%c0_6, %c0_7] : memref<1x2xf32, #tpu.memory_space<vmem>>, vector<1x2xf32>
    %13 = vector.shape_cast %12 : vector<1x2xf32> to vector<1x1x2xf32>
    %14 = vector.broadcast %13 : vector<1x1x2xf32> to vector<2x1x2xf32>
    %15 = arith.addf %11, %14 : vector<2x1x2xf32>
    %cst_8 = arith.constant 0.000000e+00 : f32
    %16 = vector.broadcast %cst_8 : f32 to vector<2x1x2xf32>
    %17 = arith.maximumf %15, %16 : vector<2x1x2xf32>
    %c0_9 = arith.constant 0 : index
    %c0_10 = arith.constant 0 : index
    %18 = vector.load %arg4[%c0_9, %c0_10] : memref<16x2xf32, #tpu.memory_space<vmem>>, vector<16x2xf32>
    %19 = vector.shape_cast %18 : vector<16x2xf32> to vector<1x16x2xf32>
    %20 = vector.broadcast %17 : vector<2x1x2xf32> to vector<2x16x2xf32>
    %21 = vector.broadcast %19 : vector<1x16x2xf32> to vector<2x16x2xf32>
    %22 = arith.mulf %20, %21 : vector<2x16x2xf32>
    %cst_11 = arith.constant dense<0.000000e+00> : vector<2x16xf32>
    %23 = vector.multi_reduction <add>, %22, %cst_11 [2] : vector<2x16x2xf32> to vector<2x16xf32>
    %24 = vector.shape_cast %23 : vector<2x16xf32> to vector<2x16x1xf32>
    %c0_12 = arith.constant 0 : index
    %c0_13 = arith.constant 0 : index
    %25 = vector.load %arg5[%c0_12, %c0_13] : memref<16x1xf32, #tpu.memory_space<vmem>>, vector<16x1xf32>
    %26 = vector.shape_cast %25 : vector<16x1xf32> to vector<1x16x1xf32>
    %27 = vector.broadcast %26 : vector<1x16x1xf32> to vector<2x16x1xf32>
    %28 = arith.addf %24, %27 : vector<2x16x1xf32>
    %29 = arith.negf %28 : vector<2x16x1xf32>
    %30 = math.exp %29 : vector<2x16x1xf32>
    %cst_14 = arith.constant 1.000000e+00 : f32
    %31 = vector.broadcast %cst_14 : f32 to vector<2x16x1xf32>
    %32 = arith.addf %31, %30 : vector<2x16x1xf32>
    %33 = arith.divf %31, %32 : vector<2x16x1xf32>
    %34 = vector.broadcast %33 : vector<2x16x1xf32> to vector<2x16x256xf32>
    %35 = arith.mulf %0, %34 : vector<2x16x256xf32>
    %cst_15 = arith.constant dense<0.000000e+00> : vector<2x256xf32>
    %36 = vector.multi_reduction <add>, %35, %cst_15 [1] : vector<2x16x256xf32> to vector<2x256xf32>
    %cst_16 = arith.constant 6.250000e-02 : f32
    %37 = vector.broadcast %cst_16 : f32 to vector<2x256xf32>
    %38 = arith.mulf %36, %37 : vector<2x256xf32>
    %cst_17 = arith.constant dense<0xFF800000> : vector<2x256xf32>
    %39 = vector.multi_reduction <maximumf>, %35, %cst_17 [1] : vector<2x16x256xf32> to vector<2x256xf32>
    %40 = tpu.concatenate %38, %39 in 0 : vector<2x256xf32>, vector<2x256xf32> -> vector<4x256xf32>
    %41 = tpu.iota {dimensions = array<i32: 0>} : vector<4x1xi32>
    %c2_i32 = arith.constant 2 : i32
    %42 = vector.broadcast %c2_i32 : i32 to vector<4x1xi32>
    %43 = arith.cmpi slt, %41, %42 : vector<4x1xi32>
    %44 = arith.extui %43 : vector<4x1xi1> to vector<4x1xi32>
    %45 = arith.sitofp %44 : vector<4x1xi32> to vector<4x1xf32>
    %c0_18 = arith.constant 0 : index
    %46 = memref.load %arg7[%c0_18] : memref<18xf32, #tpu.memory_space<smem>>
    %c1 = arith.constant 1 : index
    %47 = memref.load %arg7[%c1] : memref<18xf32, #tpu.memory_space<smem>>
    %c2 = arith.constant 2 : index
    %48 = memref.load %arg7[%c2] : memref<18xf32, #tpu.memory_space<smem>>
    %c3 = arith.constant 3 : index
    %49 = memref.load %arg7[%c3] : memref<18xf32, #tpu.memory_space<smem>>
    %c4 = arith.constant 4 : index
    %50 = memref.load %arg7[%c4] : memref<18xf32, #tpu.memory_space<smem>>
    %c5 = arith.constant 5 : index
    %51 = memref.load %arg7[%c5] : memref<18xf32, #tpu.memory_space<smem>>
    %c6 = arith.constant 6 : index
    %52 = memref.load %arg7[%c6] : memref<18xf32, #tpu.memory_space<smem>>
    %c7 = arith.constant 7 : index
    %53 = memref.load %arg7[%c7] : memref<18xf32, #tpu.memory_space<smem>>
    %c8 = arith.constant 8 : index
    %54 = memref.load %arg7[%c8] : memref<18xf32, #tpu.memory_space<smem>>
    %c9 = arith.constant 9 : index
    %55 = memref.load %arg7[%c9] : memref<18xf32, #tpu.memory_space<smem>>
    %c10 = arith.constant 10 : index
    %56 = memref.load %arg7[%c10] : memref<18xf32, #tpu.memory_space<smem>>
    %c11 = arith.constant 11 : index
    %57 = memref.load %arg7[%c11] : memref<18xf32, #tpu.memory_space<smem>>
    %c12 = arith.constant 12 : index
    %58 = memref.load %arg7[%c12] : memref<18xf32, #tpu.memory_space<smem>>
    %c13 = arith.constant 13 : index
    %59 = memref.load %arg7[%c13] : memref<18xf32, #tpu.memory_space<smem>>
    %c14 = arith.constant 14 : index
    %60 = memref.load %arg7[%c14] : memref<18xf32, #tpu.memory_space<smem>>
    %c15 = arith.constant 15 : index
    %61 = memref.load %arg7[%c15] : memref<18xf32, #tpu.memory_space<smem>>
    %c16 = arith.constant 16 : index
    %62 = memref.load %arg7[%c16] : memref<18xf32, #tpu.memory_space<smem>>
    %c17 = arith.constant 17 : index
    %63 = memref.load %arg7[%c17] : memref<18xf32, #tpu.memory_space<smem>>
    %cst_19 = arith.constant 0.000000e+00 : f32
    %64 = vector.broadcast %cst_19 : f32 to vector<4x256xf32>
    %c17_i32 = arith.constant 17 : i32
    %65 = tpu.dynamic_rotate %40 by %c17_i32 dim 1 : vector<4x256xf32>, i32 -> vector<4x256xf32>
    %c0_20 = arith.constant 0 : index
    %c0_21 = arith.constant 0 : index
    %66 = vector.load %arg6[%c0_20, %c0_21] : memref<9x256xf32, #tpu.memory_space<vmem>>, vector<1x256xf32>
    %67 = vector.broadcast %66 : vector<1x256xf32> to vector<4x256xf32>
    %68 = arith.mulf %65, %67 : vector<4x256xf32>
    %69 = arith.subf %46, %55 : f32
    %70 = vector.broadcast %69 : f32 to vector<4x1xf32>
    %71 = arith.mulf %70, %45 : vector<4x1xf32>
    %72 = vector.broadcast %55 : f32 to vector<4x1xf32>
    %73 = arith.addf %72, %71 : vector<4x1xf32>
    %74 = vector.broadcast %73 : vector<4x1xf32> to vector<4x256xf32>
    %75 = arith.mulf %74, %68 : vector<4x256xf32>
    %76 = arith.addf %64, %75 : vector<4x256xf32>
    %c16_i32 = arith.constant 16 : i32
    %77 = tpu.dynamic_rotate %40 by %c16_i32 dim 1 : vector<4x256xf32>, i32 -> vector<4x256xf32>
    %c1_22 = arith.constant 1 : index
    %c0_23 = arith.constant 0 : index
    %78 = vector.load %arg6[%c1_22, %c0_23] : memref<9x256xf32, #tpu.memory_space<vmem>>, vector<1x256xf32>
    %79 = vector.broadcast %78 : vector<1x256xf32> to vector<4x256xf32>
    %80 = arith.mulf %77, %79 : vector<4x256xf32>
    %81 = arith.subf %47, %56 : f32
    %82 = vector.broadcast %81 : f32 to vector<4x1xf32>
    %83 = arith.mulf %82, %45 : vector<4x1xf32>
    %84 = vector.broadcast %56 : f32 to vector<4x1xf32>
    %85 = arith.addf %84, %83 : vector<4x1xf32>
    %86 = vector.broadcast %85 : vector<4x1xf32> to vector<4x256xf32>
    %87 = arith.mulf %86, %80 : vector<4x256xf32>
    %88 = arith.addf %76, %87 : vector<4x256xf32>
    %c15_i32 = arith.constant 15 : i32
    %89 = tpu.dynamic_rotate %40 by %c15_i32 dim 1 : vector<4x256xf32>, i32 -> vector<4x256xf32>
    %c2_24 = arith.constant 2 : index
    %c0_25 = arith.constant 0 : index
    %90 = vector.load %arg6[%c2_24, %c0_25] : memref<9x256xf32, #tpu.memory_space<vmem>>, vector<1x256xf32>
    %91 = vector.broadcast %90 : vector<1x256xf32> to vector<4x256xf32>
    %92 = arith.mulf %89, %91 : vector<4x256xf32>
    %93 = arith.subf %48, %57 : f32
    %94 = vector.broadcast %93 : f32 to vector<4x1xf32>
    %95 = arith.mulf %94, %45 : vector<4x1xf32>
    %96 = vector.broadcast %57 : f32 to vector<4x1xf32>
    %97 = arith.addf %96, %95 : vector<4x1xf32>
    %98 = vector.broadcast %97 : vector<4x1xf32> to vector<4x256xf32>
    %99 = arith.mulf %98, %92 : vector<4x256xf32>
    %100 = arith.addf %88, %99 : vector<4x256xf32>
    %c1_i32 = arith.constant 1 : i32
    %101 = tpu.dynamic_rotate %40 by %c1_i32 dim 1 : vector<4x256xf32>, i32 -> vector<4x256xf32>
    %c3_26 = arith.constant 3 : index
    %c0_27 = arith.constant 0 : index
    %102 = vector.load %arg6[%c3_26, %c0_27] : memref<9x256xf32, #tpu.memory_space<vmem>>, vector<1x256xf32>
    %103 = vector.broadcast %102 : vector<1x256xf32> to vector<4x256xf32>
    %104 = arith.mulf %101, %103 : vector<4x256xf32>
    %105 = arith.subf %49, %58 : f32
    %106 = vector.broadcast %105 : f32 to vector<4x1xf32>
    %107 = arith.mulf %106, %45 : vector<4x1xf32>
    %108 = vector.broadcast %58 : f32 to vector<4x1xf32>
    %109 = arith.addf %108, %107 : vector<4x1xf32>
    %110 = vector.broadcast %109 : vector<4x1xf32> to vector<4x256xf32>
    %111 = arith.mulf %110, %104 : vector<4x256xf32>
    %112 = arith.addf %100, %111 : vector<4x256xf32>
    %113 = arith.subf %50, %59 : f32
    %114 = vector.broadcast %113 : f32 to vector<4x1xf32>
    %115 = arith.mulf %114, %45 : vector<4x1xf32>
    %116 = vector.broadcast %59 : f32 to vector<4x1xf32>
    %117 = arith.addf %116, %115 : vector<4x1xf32>
    %118 = vector.broadcast %117 : vector<4x1xf32> to vector<4x256xf32>
    %119 = arith.mulf %118, %40 : vector<4x256xf32>
    %120 = arith.addf %112, %119 : vector<4x256xf32>
    %c255_i32 = arith.constant 255 : i32
    %121 = tpu.dynamic_rotate %40 by %c255_i32 dim 1 : vector<4x256xf32>, i32 -> vector<4x256xf32>
    %c5_28 = arith.constant 5 : index
    %c0_29 = arith.constant 0 : index
    %122 = vector.load %arg6[%c5_28, %c0_29] : memref<9x256xf32, #tpu.memory_space<vmem>>, vector<1x256xf32>
    %123 = vector.broadcast %122 : vector<1x256xf32> to vector<4x256xf32>
    %124 = arith.mulf %121, %123 : vector<4x256xf32>
    %125 = arith.subf %51, %60 : f32
    %126 = vector.broadcast %125 : f32 to vector<4x1xf32>
    %127 = arith.mulf %126, %45 : vector<4x1xf32>
    %128 = vector.broadcast %60 : f32 to vector<4x1xf32>
    %129 = arith.addf %128, %127 : vector<4x1xf32>
    %130 = vector.broadcast %129 : vector<4x1xf32> to vector<4x256xf32>
    %131 = arith.mulf %130, %124 : vector<4x256xf32>
    %132 = arith.addf %120, %131 : vector<4x256xf32>
    %c241_i32 = arith.constant 241 : i32
    %133 = tpu.dynamic_rotate %40 by %c241_i32 dim 1 : vector<4x256xf32>, i32 -> vector<4x256xf32>
    %c6_30 = arith.constant 6 : index
    %c0_31 = arith.constant 0 : index
    %134 = vector.load %arg6[%c6_30, %c0_31] : memref<9x256xf32, #tpu.memory_space<vmem>>, vector<1x256xf32>
    %135 = vector.broadcast %134 : vector<1x256xf32> to vector<4x256xf32>
    %136 = arith.mulf %133, %135 : vector<4x256xf32>
    %137 = arith.subf %52, %61 : f32
    %138 = vector.broadcast %137 : f32 to vector<4x1xf32>
    %139 = arith.mulf %138, %45 : vector<4x1xf32>
    %140 = vector.broadcast %61 : f32 to vector<4x1xf32>
    %141 = arith.addf %140, %139 : vector<4x1xf32>
    %142 = vector.broadcast %141 : vector<4x1xf32> to vector<4x256xf32>
    %143 = arith.mulf %142, %136 : vector<4x256xf32>
    %144 = arith.addf %132, %143 : vector<4x256xf32>
    %c240_i32 = arith.constant 240 : i32
    %145 = tpu.dynamic_rotate %40 by %c240_i32 dim 1 : vector<4x256xf32>, i32 -> vector<4x256xf32>
    %c7_32 = arith.constant 7 : index
    %c0_33 = arith.constant 0 : index
    %146 = vector.load %arg6[%c7_32, %c0_33] : memref<9x256xf32, #tpu.memory_space<vmem>>, vector<1x256xf32>
    %147 = vector.broadcast %146 : vector<1x256xf32> to vector<4x256xf32>
    %148 = arith.mulf %145, %147 : vector<4x256xf32>
    %149 = arith.subf %53, %62 : f32
    %150 = vector.broadcast %149 : f32 to vector<4x1xf32>
    %151 = arith.mulf %150, %45 : vector<4x1xf32>
    %152 = vector.broadcast %62 : f32 to vector<4x1xf32>
    %153 = arith.addf %152, %151 : vector<4x1xf32>
    %154 = vector.broadcast %153 : vector<4x1xf32> to vector<4x256xf32>
    %155 = arith.mulf %154, %148 : vector<4x256xf32>
    %156 = arith.addf %144, %155 : vector<4x256xf32>
    %c239_i32 = arith.constant 239 : i32
    %157 = tpu.dynamic_rotate %40 by %c239_i32 dim 1 : vector<4x256xf32>, i32 -> vector<4x256xf32>
    %c8_34 = arith.constant 8 : index
    %c0_35 = arith.constant 0 : index
    %158 = vector.load %arg6[%c8_34, %c0_35] : memref<9x256xf32, #tpu.memory_space<vmem>>, vector<1x256xf32>
    %159 = vector.broadcast %158 : vector<1x256xf32> to vector<4x256xf32>
    %160 = arith.mulf %157, %159 : vector<4x256xf32>
    %161 = arith.subf %54, %63 : f32
    %162 = vector.broadcast %161 : f32 to vector<4x1xf32>
    %163 = arith.mulf %162, %45 : vector<4x1xf32>
    %164 = vector.broadcast %63 : f32 to vector<4x1xf32>
    %165 = arith.addf %164, %163 : vector<4x1xf32>
    %166 = vector.broadcast %165 : vector<4x1xf32> to vector<4x256xf32>
    %167 = arith.mulf %166, %160 : vector<4x256xf32>
    %168 = arith.addf %156, %167 : vector<4x256xf32>
    %169 = vector.extract_strided_slice %168 {offsets = [0, 0], sizes = [2, 256], strides = [1, 1]} : vector<4x256xf32> to vector<2x256xf32>
    %170 = vector.extract_strided_slice %168 {offsets = [2, 0], sizes = [2, 256], strides = [1, 1]} : vector<4x256xf32> to vector<2x256xf32>
    %171 = arith.addf %169, %170 : vector<2x256xf32>
    %cst_36 = arith.constant 0.000000e+00 : f32
    %172 = vector.broadcast %cst_36 : f32 to vector<2x256xf32>
    %173 = arith.subf %172, %171 : vector<2x256xf32>
    %174 = math.exp %173 : vector<2x256xf32>
    %cst_37 = arith.constant 1.000000e+00 : f32
    %175 = vector.broadcast %cst_37 : f32 to vector<2x256xf32>
    %176 = arith.addf %175, %174 : vector<2x256xf32>
    %177 = tpu.reciprocal %176 : vector<2x256xf32> -> vector<2x256xf32>
    %c0_38 = arith.constant 0 : index
    %c0_39 = arith.constant 0 : index
    %c0_40 = arith.constant 0 : index
    %178 = vector.load %arg1[%c0_38, %c0_39, %c0_40] : memref<2x16x256xf32, #tpu.memory_space<vmem>>, vector<2x16x256xf32>
    %179 = vector.broadcast %33 : vector<2x16x1xf32> to vector<2x16x256xf32>
    %180 = arith.mulf %178, %179 : vector<2x16x256xf32>
    %181 = vector.shape_cast %177 : vector<2x256xf32> to vector<2x1x256xf32>
    %182 = vector.broadcast %181 : vector<2x1x256xf32> to vector<2x16x256xf32>
    %183 = arith.mulf %182, %180 : vector<2x16x256xf32>
    %c0_41 = arith.constant 0 : index
    %c0_42 = arith.constant 0 : index
    %c0_43 = arith.constant 0 : index
    %184 = vector.load %arg8[%c0_41, %c0_42, %c0_43] : memref<2x16x256xf32, #tpu.memory_space<vmem>>, vector<2x16x256xf32>
    tpu.vector_store %arg8[%c0_41, %c0_42, %c0_43], %183 {strides = array<i32>} : memref<2x16x256xf32, #tpu.memory_space<vmem>>, vector<2x16x256xf32>,
    return
  }
  func.func @transform_0(%arg0: i32) -> (i32, i32, i32) {
    %c0_i32 = arith.constant 0 : i32
    %c0_i32_0 = arith.constant 0 : i32
    %c0_i32_1 = arith.constant 0 : i32
    return %arg0, %c0_i32, %c0_i32_0 : i32, i32, i32
  }
  func.func @transform_1(%arg0: i32) -> (i32, i32) {
    %c0_i32 = arith.constant 0 : i32
    %c0_i32_0 = arith.constant 0 : i32
    %c0_i32_1 = arith.constant 0 : i32
    return %c0_i32, %c0_i32_0 : i32, i32
  }
  func.func @transform_2(%arg0: i32) -> (i32, i32) {
    %c0_i32 = arith.constant 0 : i32
    %c0_i32_0 = arith.constant 0 : i32
    %c0_i32_1 = arith.constant 0 : i32
    return %c0_i32, %c0_i32_0 : i32, i32
  }
  func.func @transform_3(%arg0: i32) -> (i32, i32) {
    %c0_i32 = arith.constant 0 : i32
    %c0_i32_0 = arith.constant 0 : i32
    %c0_i32_1 = arith.constant 0 : i32
    return %c0_i32, %c0_i32_0 : i32, i32
  }
  func.func @transform_4(%arg0: i32) -> (i32, i32) {
    %c0_i32 = arith.constant 0 : i32
    %c0_i32_0 = arith.constant 0 : i32
    %c0_i32_1 = arith.constant 0 : i32
    return %c0_i32, %c0_i32_0 : i32, i32
  }
  func.func @transform_5(%arg0: i32) -> (i32, i32) {
    %c0_i32 = arith.constant 0 : i32
    %c0_i32_0 = arith.constant 0 : i32
    %c0_i32_1 = arith.constant 0 : i32
    return %c0_i32, %c0_i32_0 : i32, i32
  }
  func.func @transform_6(%arg0: i32) -> i32 {
    %c0_i32 = arith.constant 0 : i32
    %c0_i32_0 = arith.constant 0 : i32
    return %c0_i32 : i32
  }
  func.func @transform_7(%arg0: i32) -> (i32, i32, i32) {
    %c0_i32 = arith.constant 0 : i32
    %c0_i32_0 = arith.constant 0 : i32
    %c0_i32_1 = arith.constant 0 : i32
    return %arg0, %c0_i32, %c0_i32_0 : i32, i32, i32
  }
}

</mosaic_0001>

<bundles_post_ra>
// kernel: tpu_custom_call.1
= control target key start
LH: loop header
LB: loop body
LE: loop exit
PB: predicated region body
PF: predicated region fallthrough
CT: control target
= control target key end

     0   :  { %12 = vsyncpa [#allocation3], 0  ;;  %s1169_s0 = inlined_call_operand.hbm [shape: f32[2,16,256], index: 0, kind: input, shape index: {}]   ;;  %s1170_s1 = inlined_call_operand.vmem [shape: f32[16,2], index: 1, kind: input, shape index: {}]   ;;  %s1171_s2 = inlined_call_operand.vmem [shape: f32[1,2], index: 2, kind: input, shape index: {}]   ;;  %s1172_s3 = inlined_call_operand.vmem [shape: f32[16,2], index: 3, kind: input, shape index: {}]   ;;  %s1173_s4 = inlined_call_operand.vmem [shape: f32[16,1], index: 4, kind: input, shape index: {}]   ;;  %s1174_s5 = inlined_call_operand.vmem [shape: f32[9,256], index: 5, kind: input, shape index: {}]   ;;  %s1175_s6 = inlined_call_operand.vmem [shape: f32[18], index: 6, kind: input, shape index: {}]   ;;  %s1176_s7 = inlined_call_operand.hbm [shape: f32[2,16,256], index: 7, kind: output, shape index: {}]  }
   0x1   :  { %13 = vsyncpa [#allocation5], 0 }
   0x2   :  { %14 = vsyncpa [#allocation4], 0  ;;  %s783_s24 = smov [#allocation2]   ;;  %s43_s28 = sshll.u32 %s1175_s6, 4  ;;  %s44_s28 = int_to_ptr.vmem [resolvable:$true] %s43_s28 }
   0x3   :  { %s20_s25 = sshll.u32 %s783_s24, 4  ;;  %s721_s8 = scalar_lea.hbm %s1169_s0, 1024  ;;  %s21_s25 = int_to_ptr.vmem [resolvable:$true] %s20_s25 }
   0x4   :  { %p722_p0 = scmp.ne.s32.totalorder %s1169_s0, %s721_s8  ;;  %p725_p1 = scmp.lt.u32.totalorder %s721_s8, %s1169_s0 }
   0x6   :  { %p727_p2 = pnand %p725_p1, %p722_p0 }
   0x8   :  { %730 = shalt.err (!%p727_p2)
}
   0x9   :  { %s731_s13 = scalar_lea.vmem %s21_s25, 1024  ;;  %p736_p4 = scmp.lt.s32.totalorder %s21_s25, %s21_s25 }
   0xa   :  { %p732_p3 = scmp.ne.s32.totalorder %s21_s25, %s731_s13  ;;  %p737_p5 = scmp.lt.s32.totalorder %s731_s13, %s731_s13 }
   0xc   :  { %p738_p6 = por %p737_p5, %p736_p4 }
   0xe   :  { %p739_p7 = pnand %p738_p6, %p732_p3 }
  0x10   :  { %742 = shalt.err (!%p739_p7)
}
  0x11   :  { %s784_s6 = smov 256   ;;  %s785_s14 = smov 16  }
  0x12   :  { %26 = dma.hbm_to_vmem [thread:$0]  %s1169_s0, 1024, %s21_s25, [#allocation3], %s784_s6, %s784_s6, %s785_s14  }
  0x13   :  { %s743_s17 = scalar_lea.vmem %s44_s28, 16  ;;  %p748_p9 = scmp.lt.s32.totalorder %s44_s28, %s44_s28 }
  0x14   :  { %p744_p8 = scmp.ne.s32.totalorder %s44_s28, %s743_s17  ;;  %p749_p10 = scmp.lt.s32.totalorder %s743_s17, %s743_s17 }
  0x16   :  { %p750_p11 = por %p749_p10, %p748_p9 }
  0x18   :  { %p751_p12 = pnand %p750_p11, %p744_p8 }
  0x1a   :  { %754 = shalt.err (!%p751_p12)
}
  0x1b   :  { %s786_s18 = smov [#allocation6]  }
  0x1c   :  { %46 = dma.vmem_to_smem %s44_s28, 16, %s786_s18, [#allocation5]  }
  0x1d   :  { %777 = dma.done.wait [#allocation3], 1024  }
  0x1e   :  { %778 = vsyncadd [#allocation3], 4294966272 }
  0x1f   :  { %779 = dma.done.wait [#allocation5], 16  }
  0x20   :  { %780 = vsyncadd [#allocation5], 4294967280 }
  0x21   :  { %53 = sfence }
  0x22   :  { %v856_v0 = vld [vmem:[#allocation2 + $0x20] sm:$0xff]  ;;  %v858_v1 = vld [vmem:[#allocation2 + $0x28] sm:$0xff]  ;;  %v866_v5 = vld [vmem:[#allocation2 + $0x30] sm:$0xff]  ;;  %vm84_vm0 = vcmask 15360   ;;  %v110_v38 = vlaneseq  ;;  %vm256_vm1 = vcmask 1041409   ;;  %vm265_vm2 = vcmask 1043459  }
  0x23   :  { %v860_v2 = vld [vmem:[#allocation2] sm:$0xff]  ;;  %v68_v3 = vadd.f32 %v858_v1, %v856_v0  ;;  %v864_v4 = vld [vmem:[#allocation2 + $0x8] sm:$0xff]  ;;  %v868_v6 = vld [vmem:[#allocation2 + $0x38] sm:$0xff]  ;;  %vm270_vm3 = vcmask 1041408   ;;  %s789_s29 = smov 17   ;;  %s790_s30 = smov 1  }
  0x24   :  { %v62_v7 = vadd.f32 %v864_v4, %v860_v2  ;;  %v872_v8 = vld [vmem:[#allocation2 + $0x10] sm:$0xff]  ;;  %v874_v9 = vld [vmem:[#allocation2 + $0x18] sm:$0xff]  ;;  %v71_v10 = vadd.f32 %v868_v6, %v866_v5  ;;  %v78_v15 = vld [vmem:[%s1170_s1] sm:$0xff]  ;;  %v894_v44 = vshrl.u32 %v110_v38, 7  ;;  %s791_s8 = smov 127   ;;  %s792_s9 = smov 113  }
  0x25   :  { %69 = vadd.xlane.f32.xlu1 %v68_v3  ;;  %v65_v11 = vadd.f32 %v874_v9, %v872_v8  ;;  %v79_v18 = vld [vmem:[%s1170_s1 + $0x8] sm:$0xff]  ;;  %v103_v43 = vld [vmem:[%s1171_s2] sm:$0x1]  ;;  %v787_v3 = vmov 0   ;;  %s793_s10 = smov 112   ;;  %s794_s11 = smov 111  }
  0x26   :  { %63 = vadd.xlane.f32.xlu0 %v62_v7  ;;  %v897_v49 = vsub.s32 0, %v894_v44  ;;  %v109_v52 = vld [vmem:[%s1172_s3 + $0x8] sm:$0xff]  ;;  %v108_v53 = vld [vmem:[%s1172_s3] sm:$0xff]  ;;  %696 = vset.pattern.permute.xlu1 %v787_v3  ;;  %s659_s12 = sld [smem:[#allocation6 + $0x4]]  ;;  %s979_s13 = sld [smem:[#allocation6 + $0xd]]  ;;  %vm275_vm4 = vcmp.lt.s32.totalorder %v894_v44, 2 }
  0x27   :  { %695 = vset.pattern.permute.xlu0 %v787_v3  ;;  %v135_v7 = vld [vmem:[%s1173_s4 + $0x8] sm:$0xff]  ;;  %s278_s15 = sld [smem:[#allocation6]]  ;;  %s981_s16 = sld [smem:[#allocation6 + $0x9]] }
  0x28   :  { %s983_s17 = sld [smem:[#allocation6 + $0x1]]  ;;  %s985_s18 = sld [smem:[#allocation6 + $0xa]] }
  0x29   :  { %72 = vadd.xlane.f32.xlu1 %v71_v10  ;;  %v134_v10 = vld [vmem:[%s1173_s4] sm:$0xff]  ;;  %s788_s4 = smov 15   ;;  %s987_s0 = sld [smem:[#allocation6 + $0x2]] }
  0x2a   :  { %66 = vadd.xlane.f32.xlu0 %v65_v11  ;;  %s989_s19 = sld [smem:[#allocation6 + $0xb]]  ;;  %s995_s1 = sld [smem:[#allocation6 + $0xc]] }
  0x2b   :  { %s993_s21 = sld [smem:[#allocation6 + $0x3]]  ;;  %s1011_s25 = sld [smem:[#allocation6 + $0x5]] }
  0x2c   :  { %s421_s20 = ssub.f32 %s659_s12, %s979_s13  ;;  %s1013_s26 = sld [smem:[#allocation6 + $0xe]] }
  0x2d   :  { %s319_s22 = ssub.f32 %s278_s15, %s981_s16 }
  0x2e   :  { %s350_s23 = ssub.f32 %s983_s17, %s985_s18  ;;  %s1068_s17 = sld [smem:[#allocation6 + $0x11]] }
  0x30   :  { %s381_s24 = ssub.f32 %s987_s0, %s989_s19 }
  0x32   :  { %s452_s15 = ssub.f32 %s1011_s25, %s1013_s26 }
  0xb2   :  { %v70_v12 = vpop.xlane.xlu1 %69 }
  0xb3   :  { %v76_v13 = vmul.f32 0.00390625, %v70_v12  ;;  %v64_v14 = vpop.xlane.xlu0 %63 }
  0xb4   :  { %v74_v16 = vmul.f32 0.00390625, %v64_v14 }
  0xb5   :  { %v82_v17 = vmul.f32 %v78_v15, %v76_v13 }
  0xb6   :  { %v73_v19 = vpop.xlane.xlu1 %72  ;;  %v80_v22 = vmul.f32 %v78_v15, %v74_v16 }
  0xb7   :  { %v77_v20 = vmul.f32 0.00390625, %v73_v19  ;;  %v67_v21 = vpop.xlane.xlu0 %66  ;;  %v94_v24 = vsel %vm84_vm0, %v82_v17, 0.0 }
  0xb8   :  { %v75_v23 = vmul.f32 0.00390625, %v67_v21  ;;  %v85_v28 = vsel %vm84_vm0, %v80_v22, 0.0 }
  0xb9   :  { %v83_v25 = vmul.f32 %v79_v18, %v77_v20 }
  0xba   :  { %v81_v26 = vmul.f32 %v79_v18, %v75_v23 }
  0xbb   :  { %v95_v27 = vsel %vm84_vm0, %v83_v25, 0.0 }
  0xbc   :  { %v96_v29 = vadd.f32 %v95_v27, %v94_v24  ;;  %v86_v30 = vsel %vm84_vm0, %v81_v26, 0.0 }
  0xbd   :  { %v87_v31 = vadd.f32 %v86_v30, %v85_v28 }
  0xbe   :  { %v97_v32 = vrot.slane %v96_v29, 4 }
  0xbf   :  { %v88_v33 = vrot.slane %v87_v31, 4 }
  0xc0   :  { %v98_v34 = vadd.f32 %v97_v32, %v96_v29 }
  0xc1   :  { %v89_v35 = vadd.f32 %v88_v33, %v87_v31 }
  0xc2   :  { %v99_v36 = vrot.slane %v98_v34, 2 }
  0xc3   :  { %v90_v37 = vrot.slane %v89_v35, 2 }
  0xc4   :  { %v100_v39 = vadd.f32 %v99_v36, %v98_v34 }
  0xc5   :  { %v91_v40 = vadd.f32 %v90_v37, %v89_v35 }
  0xc6   :  { %v101_v41 = vrot.slane %v100_v39, 1 }
  0xc7   :  { %v92_v42 = vrot.slane %v91_v40, 1 }
  0xc8   :  { %v102_v45 = vadd.f32 %v101_v41, %v100_v39 }
  0xc9   :  { %v93_v46 = vadd.f32 %v92_v42, %v91_v40 }
  0xca   :  { %v105_v47 = vadd.f32 %v103_v43, %v102_v45 }
  0xcb   :  { %v104_v48 = vadd.f32 %v103_v43, %v93_v46 }
  0xcc   :  { %v107_v50 = vmax.f32 %v105_v47, 0.0 }
  0xcd   :  { %v106_v51 = vmax.f32 %v104_v48, 0.0 }
  0xce   :  { %v117_v55 = vrot.slane %v107_v50, %v897_v49 }
  0xcf   :  { %v113_v54 = vrot.slane %v106_v51, %v897_v49 }
  0xd0   :  { %v121_v60 = vmul.f32 %v117_v55, %v109_v52  ;;  %v120_v61 = vmul.f32 %v117_v55, %v108_v53 }
  0xd1   :  { %v119_v56 = vmul.f32 %v113_v54, %v109_v52  ;;  %v118_v57 = vmul.f32 %v113_v54, %v108_v53 }
  0xd2   :  { %v131_v62 = vsel %vm84_vm0, %v121_v60, 0.0  ;;  %v128_v63 = vsel %vm84_vm0, %v120_v61, 0.0 }
  0xd3   :  { %v125_v58 = vsel %vm84_vm0, %v119_v56, 0.0  ;;  %v122_v59 = vsel %vm84_vm0, %v118_v57, 0.0 }
  0xd4   :  { %126 = vadd.xlane.f32.xlu1 %v125_v58  ;;  %123 = vadd.xlane.f32.xlu0 %v122_v59 }
  0xd8   :  { %132 = vadd.xlane.f32.xlu1 %v131_v62  ;;  %129 = vadd.xlane.f32.xlu0 %v128_v63 }
 0x161   :  { %v127_v11 = vpop.xlane.xlu1 %126  ;;  %v124_v12 = vpop.xlane.xlu0 %123 }
 0x162   :  { %v137_v13 = vadd.f32 %v135_v7, %v127_v11  ;;  %v136_v14 = vadd.f32 %v134_v10, %v124_v12 }
 0x164   :  { %v652_v15 = vmul.f32 -1.442695, %v137_v13  ;;  %v651_v16 = vmul.f32 -1.442695, %v136_v14 }
 0x165   :  { %v133_v17 = vpop.xlane.xlu1 %132  ;;  %v130_v18 = vpop.xlane.xlu0 %129 }
 0x166   :  { %697 = vpow2.f32 %v652_v15  ;;  %v139_v19 = vadd.f32 %v135_v7, %v133_v17  ;;  %v138_v20 = vadd.f32 %v134_v10, %v130_v18 }
 0x167   :  { %699 = vpow2.f32 %v651_v16 }
 0x168   :  { %v654_v21 = vmul.f32 -1.442695, %v139_v19  ;;  %v653_v22 = vmul.f32 -1.442695, %v138_v20 }
 0x16a   :  { %701 = vpow2.f32 %v654_v21 }
 0x16b   :  { %703 = vpow2.f32 %v653_v22 }
 0x170   :  { %v698_v23 = vpop.eup %697 }
 0x171   :  { %v700_v24 = vpop.eup %699  ;;  %v153_v25 = vadd.f32 1.0, %v698_v23 }
 0x172   :  { %v152_v26 = vadd.f32 1.0, %v700_v24 }
 0x173   :  { %705 = vrcp.f32 %v153_v25 }
 0x174   :  { %v702_v27 = vpop.eup %701  ;;  %707 = vrcp.f32 %v152_v26 }
 0x175   :  { %v704_v28 = vpop.eup %703  ;;  %v155_v30 = vadd.f32 1.0, %v702_v27 }
 0x176   :  { %v154_v29 = vadd.f32 1.0, %v704_v28 }
 0x178   :  { %709 = vrcp.f32 %v154_v29 }
 0x179   :  { %711 = vrcp.f32 %v155_v30 }
 0x17d   :  { %v706_v31 = vpop.eup %705 }
 0x17e   :  { %v708_v32 = vpop.eup %707  ;;  %171 = vperm.xlu1 %696, %v706_v31  }
 0x17f   :  { %166 = vperm.xlu0 %695, %v708_v32  }
 0x182   :  { %v710_v33 = vpop.eup %709 }
 0x183   :  { %176 = vperm.xlu1 %696, %v710_v33   ;;  %v712_v34 = vpop.eup %711 }
 0x187   :  { %181 = vperm.xlu1 %696, %v712_v34  }
 0x1fd   :  { %v172_v35 = vpop.permute.xlu1 %171 }
 0x1fe   :  { %v918_v36 = vmul.f32 %v172_v35, %v872_v8  ;;  %v921_v37 = vmul.f32 %v172_v35, %v874_v9  ;;  %v167_v39 = vpop.permute.xlu0 %166 }
 0x1ff   :  { %v924_v40 = vmul.f32 %v167_v39, %v860_v2  ;;  %v927_v41 = vmul.f32 %v167_v39, %v864_v4 }
 0x201   :  { %v192_v42 = vadd.f32 %v918_v36, %v924_v40  ;;  %v199_v43 = vadd.f32 %v921_v37, %v927_v41  ;;  %v224_v8 = vmax.f32 %v924_v40, %v918_v36  ;;  %v231_v9 = vmax.f32 %v927_v41, %v921_v37 }
 0x202   :  { %v177_v45 = vpop.permute.xlu1 %176 }
 0x203   :  { %v193_v46 = vrot.slane %v192_v42, 4  ;;  %v200_v47 = vrot.slane %v199_v43, 4  ;;  %v225_v2 = vrot.slane %v224_v8, 4  ;;  %v232_v48 = vrot.slane %v231_v9, 4 }
 0x204   :  { %v938_v56 = vmul.f32 %v177_v45, %v856_v0  ;;  %v941_v57 = vmul.f32 %v177_v45, %v858_v1 }
 0x205   :  { %v194_v50 = vadd.f32 %v193_v46, %v192_v42  ;;  %v201_v4 = vadd.f32 %v200_v47, %v199_v43  ;;  %v226_v54 = vmax.f32 %v224_v8, %v225_v2  ;;  %v233_v55 = vmax.f32 %v231_v9, %v232_v48 }
 0x206   :  { %v182_v51 = vpop.permute.xlu1 %181 }
 0x207   :  { %v195_v52 = vrot.slane %v194_v50, 2  ;;  %v202_v53 = vrot.slane %v201_v4, 2  ;;  %v944_v58 = vmul.f32 %v182_v51, %v866_v5  ;;  %v947_v59 = vmul.f32 %v182_v51, %v868_v6 }
 0x208   :  { %v227_v3 = vrot.slane %v226_v54, 2  ;;  %v234_v5 = vrot.slane %v233_v55, 2 }
 0x209   :  { %v206_v60 = vadd.f32 %v944_v58, %v938_v56  ;;  %v213_v61 = vadd.f32 %v947_v59, %v941_v57  ;;  %v238_v62 = vmax.f32 %v938_v56, %v944_v58  ;;  %v245_v0 = vmax.f32 %v941_v57, %v947_v59 }
 0x20a   :  { %v196_v1 = vadd.f32 %v195_v52, %v194_v50  ;;  %v203_v63 = vadd.f32 %v202_v53, %v201_v4  ;;  %v228_v18 = vmax.f32 %v226_v54, %v227_v3  ;;  %v235_v19 = vmax.f32 %v233_v55, %v234_v5 }
 0x20b   :  { %v207_v7 = vrot.slane %v206_v60, 4  ;;  %v214_v10 = vrot.slane %v213_v61, 4  ;;  %v239_v6 = vrot.slane %v238_v62, 4  ;;  %v246_v11 = vrot.slane %v245_v0, 4 }
 0x20c   :  { %v197_v16 = vrot.slane %v196_v1, 1  ;;  %v204_v17 = vrot.slane %v203_v63, 1  ;;  %v229_v30 = vrot.slane %v228_v18, 1  ;;  %v236_v31 = vrot.slane %v235_v19, 1 }
 0x20d   :  { %v208_v12 = vadd.f32 %v207_v7, %v206_v60  ;;  %v215_v13 = vadd.f32 %v214_v10, %v213_v61  ;;  %v240_v14 = vmax.f32 %v238_v62, %v239_v6  ;;  %v247_v15 = vmax.f32 %v245_v0, %v246_v11  ;;  %v305_v6 = vld [vmem:[%s1174_s5] ss:$8 sm:$0x3] }
 0x20e   :  { %v198_v28 = vadd.f32 %v197_v16, %v196_v1  ;;  %v205_v29 = vadd.f32 %v204_v17, %v203_v63  ;;  %v230_v9 = vmax.f32 %v228_v18, %v229_v30  ;;  %v237_v45 = vmax.f32 %v235_v19, %v236_v31  ;;  %v674_v19 = vld [vmem:[%s1174_s5 + $0x2] ss:$8 sm:$0x3] }
 0x20f   :  { %v209_v20 = vrot.slane %v208_v12, 2  ;;  %v216_v21 = vrot.slane %v215_v13, 2  ;;  %v241_v22 = vrot.slane %v240_v14, 2  ;;  %v248_v23 = vrot.slane %v247_v15, 2 }
 0x210   :  { %v220_v46 = vmul.f32 0.0625, %v198_v28  ;;  %v221_v47 = vmul.f32 0.0625, %v205_v29  ;;  %v795_v60 = vmov 0.0   ;;  %v422_v62 = vstv %s421_s20 }
 0x211   :  { %v210_v24 = vadd.f32 %v209_v20, %v208_v12  ;;  %v217_v25 = vadd.f32 %v216_v21, %v215_v13  ;;  %v242_v26 = vmax.f32 %v240_v14, %v241_v22  ;;  %v249_v27 = vmax.f32 %v247_v15, %v248_v23  ;;  %v673_v12 = vld [vmem:[%s1174_s5 + $0x1] ss:$8 sm:$0x3] }
 0x212   :  { %v998_v61 = vsel %vm275_vm4, 1.0, %v795_v60  ;;  %v320_v0 = vstv %s319_s22  ;;  %v1006_v5 = vand.u32 127, %v110_v38  ;;  %v1009_v7 = vsub.s32 1, %v894_v44 }
 0x213   :  { %v211_v32 = vrot.slane %v210_v24, 1  ;;  %v218_v33 = vrot.slane %v217_v25, 1  ;;  %v243_v34 = vrot.slane %v242_v26, 1  ;;  %v250_v35 = vrot.slane %v249_v27, 1 }
 0x214   :  { %v423_v63 = vmul.f32 %v998_v61, %v422_v62  ;;  %v424_v10 = vstv %s979_s13  ;;  %v321_v11 = vmul.f32 %v998_v61, %v320_v0  ;;  %v322_v38 = vstv %s981_s16  ;;  %s1066_s16 = sld [smem:[#allocation6 + $0x8]] }
 0x215   :  { %v212_v39 = vadd.f32 %v211_v32, %v210_v24  ;;  %v219_v42 = vadd.f32 %v218_v33, %v217_v25  ;;  %v244_v43 = vmax.f32 %v242_v26, %v243_v34  ;;  %v251_v8 = vmax.f32 %v249_v27, %v250_v35 }
 0x216   :  { %v351_v14 = vstv %s350_s23  ;;  %v382_v15 = vstv %s381_s24  ;;  %v425_v16 = vadd.f32 %v424_v10, %v423_v63  ;;  %vm302_vm5 = vcmp.lt.s32.totalorder %v1006_v5, 17 }
 0x217   :  { %v222_v2 = vmul.f32 0.0625, %v212_v39  ;;  %v223_v48 = vmul.f32 0.0625, %v219_v42  ;;  %v266_v51 = vsel %vm265_vm2, %v244_v43, %v230_v9  ;;  %v267_v52 = vsel %vm265_vm2, %v251_v8, %v237_v45  ;;  %v675_v42 = vld [vmem:[%s1174_s5 + $0x3] ss:$8 sm:$0x3] }
 0x218   :  { %v310_v17 = vrot.slane %v305_v6, %v897_v49  ;;  %v314_v18 = vrot.slane %v305_v6, %v1009_v7  ;;  %vm332_vm6 = vcmp.lt.s32.totalorder %v1006_v5, 16  ;;  %v323_v20 = vadd.f32 %v322_v38, %v321_v11 }
 0x219   :  { %v257_v50 = vsel %vm256_vm1, %v222_v2, %v220_v46  ;;  %v258_v4 = vsel %vm256_vm1, %v223_v48, %v221_v47  ;;  %v341_v21 = vrot.slane %v673_v12, %v897_v49  ;;  %v352_v22 = vmul.f32 %v998_v61, %v351_v14 }
 0x21a   :  { %v957_v53 = vsel %vm270_vm3, %v257_v50, %v266_v51  ;;  %v959_v54 = vsel %vm270_vm3, %v258_v4, %v267_v52  ;;  %v383_v23 = vmul.f32 %v998_v61, %v382_v15  ;;  %v345_v25 = vrot.slane %v673_v12, %v1009_v7  ;;  %v676_v50 = vld [vmem:[%s1174_s5 + $0x5] ss:$8 sm:$0x3]  ;;  %s545_s22 = ssub.f32 %s1066_s16, %s1068_s17 }
 0x21b   :  { %361 = vrot.lane.b32.xlu0 %v959_v54, %s788_s4  ;;  %296 = vrot.lane.b32.xlu1 %v957_v53, %s789_s29  ;;  %v353_v26 = vstv %s985_s18  ;;  %v384_v28 = vstv %s989_s19  ;;  %vm363_vm7 = vcmp.lt.s32.totalorder %v1006_v5, 15  ;;  %v1049_v32 = vmul.f32 %v425_v16, %v959_v54 }
 0x21c   :  { %v372_v35 = vrot.slane %v674_v19, %v897_v49  ;;  %v376_v39 = vrot.slane %v674_v19, %v1009_v7  ;;  %v354_v43 = vadd.f32 %v353_v26, %v352_v22  ;;  %v385_v8 = vadd.f32 %v384_v28, %v383_v23  ;;  %v677_v22 = vld [vmem:[%s1174_s5 + $0x6] ss:$8 sm:$0x3] }
 0x21d   :  { %v1064_v45 = vmul.f32 %v425_v16, %v957_v53  ;;  %vm394_vm8 = vcmp.lt.s32.totalorder %v1006_v5, 1  ;;  %v415_v48 = vstv %s995_s1  ;;  %v403_v62 = vrot.slane %v675_v42, %v897_v49 }
 0x21e   :  { %v407_v0 = vrot.slane %v675_v42, %v1009_v7  ;;  %vm434_vm9 = vcmp.lt.s32.totalorder %v1006_v5, 127  ;;  %v443_v63 = vrot.slane %v676_v50, %v897_v49  ;;  %v447_v10 = vrot.slane %v676_v50, %v1009_v7 }
 0x21f   :  { %392 = vrot.lane.b32.xlu0 %v959_v54, %s790_s30  ;;  %298 = vrot.lane.b32.xlu1 %v959_v54, %s789_s29  ;;  %s1026_s29 = sld [smem:[#allocation6 + $0x6]]  ;;  %vm465_vm10 = vcmp.lt.s32.totalorder %v1006_v5, 113  ;;  %vm496_vm11 = vcmp.lt.s32.totalorder %v1006_v5, 112  ;;  %vm527_vm12 = vcmp.lt.s32.totalorder %v1006_v5, 111 }
 0x223   :  { %432 = vrot.lane.b32.xlu0 %v959_v54, %s791_s8  ;;  %328 = vrot.lane.b32.xlu1 %v957_v53, %s785_s14 }
 0x227   :  { %463 = vrot.lane.b32.xlu0 %v959_v54, %s792_s9  ;;  %330 = vrot.lane.b32.xlu1 %v959_v54, %s785_s14 }
 0x22b   :  { %494 = vrot.lane.b32.xlu0 %v959_v54, %s793_s10  ;;  %359 = vrot.lane.b32.xlu1 %v957_v53, %s788_s4  ;;  %s412_s4 = ssub.f32 %s993_s21, %s995_s1 }
 0x22d   :  { %v413_v29 = vstv %s412_s4 }
 0x22e   :  { %v414_v9 = vmul.f32 %v998_v61, %v413_v29 }
 0x22f   :  { %525 = vrot.lane.b32.xlu0 %v959_v54, %s794_s11  ;;  %390 = vrot.lane.b32.xlu1 %v957_v53, %s790_s30  ;;  %s1028_s30 = sld [smem:[#allocation6 + $0xf]] }
 0x233   :  { %430 = vrot.lane.b32.xlu1 %v957_v53, %s791_s8 }
 0x235   :  { %s483_s19 = ssub.f32 %s1026_s29, %s1028_s30 }
 0x237   :  { %461 = vrot.lane.b32.xlu1 %v957_v53, %s792_s9  ;;  %v484_v38 = vstv %s483_s19 }
 0x23b   :  { %492 = vrot.lane.b32.xlu1 %v957_v53, %s793_s10  ;;  %s1040_s10 = sld [smem:[#allocation6 + $0x7]] }
 0x23f   :  { %523 = vrot.lane.b32.xlu1 %v957_v53, %s794_s11  ;;  %s1042_s11 = sld [smem:[#allocation6 + $0x10]] }
 0x245   :  { %s514_s20 = ssub.f32 %s1040_s10, %s1042_s11 }
 0x28d   :  { %v297_v55 = vpop.permute.xlu1 %296  ;;  %v362_v3 = vpop.permute.xlu0 %361 }
 0x291   :  { %v299_v1 = vpop.permute.xlu1 %298  ;;  %v393_v24 = vpop.permute.xlu0 %392 }
 0x292   :  { %v303_v33 = vsel %vm302_vm5, %v297_v55, %v299_v1  ;;  %v304_v34 = vsel %vm302_vm5, %v299_v1, %v297_v55  ;;  %v416_v1 = vadd.f32 %v415_v48, %v414_v9  ;;  %v546_v48 = vstv %s545_s22 }
 0x293   :  { %v317_v4 = vmul.f32 %v310_v17, %v304_v34  ;;  %v318_v51 = vmul.f32 %v314_v18, %v303_v33  ;;  %v474_v34 = vrot.slane %v677_v22, %v897_v49 }
 0x295   :  { %v329_v13 = vpop.permute.xlu1 %328  ;;  %v433_v54 = vpop.permute.xlu0 %432  ;;  %v325_v14 = vmul.f32 %v323_v20, %v318_v51 }
 0x299   :  { %v331_v27 = vpop.permute.xlu1 %330  ;;  %v464_v26 = vpop.permute.xlu0 %463 }
 0x29a   :  { %v333_v30 = vsel %vm332_vm6, %v329_v13, %v331_v27  ;;  %v334_v31 = vsel %vm332_vm6, %v331_v27, %v329_v13  ;;  %v324_v13 = vmul.f32 %v323_v20, %v317_v4  ;;  %v515_v20 = vstv %s514_s20 }
 0x29b   :  { %v348_v46 = vmul.f32 %v341_v21, %v334_v31  ;;  %v349_v47 = vmul.f32 %v345_v25, %v333_v30  ;;  %v455_v25 = vstv %s1013_s26 }
 0x29d   :  { %v360_v2 = vpop.permute.xlu1 %359  ;;  %v355_v6 = vmul.f32 %v354_v43, %v348_v46  ;;  %v356_v11 = vmul.f32 %v354_v43, %v349_v47  ;;  %v478_v43 = vrot.slane %v677_v22, %v1009_v7  ;;  %v678_v46 = vld [vmem:[%s1174_s5 + $0x7] ss:$8 sm:$0x3]  ;;  %v516_v47 = vmul.f32 %v998_v61, %v515_v20 }
 0x29e   :  { %v364_v52 = vsel %vm363_vm7, %v360_v2, %v362_v3  ;;  %v365_v53 = vsel %vm363_vm7, %v362_v3, %v360_v2  ;;  %v453_v3 = vstv %s452_s15  ;;  %v517_v2 = vstv %s1042_s11 }
 0x29f   :  { %v379_v55 = vmul.f32 %v372_v35, %v365_v53  ;;  %v380_v60 = vmul.f32 %v376_v39, %v364_v52  ;;  %v454_v23 = vmul.f32 %v998_v61, %v453_v3  ;;  %v357_v27 = vadd.f32 %v355_v6, %v324_v13 }
 0x2a0   :  { %v485_v35 = vmul.f32 %v998_v61, %v484_v38  ;;  %v505_v6 = vrot.slane %v678_v46, %v897_v49  ;;  %v548_v3 = vstv %s1068_s17 }
 0x2a1   :  { %v391_v12 = vpop.permute.xlu1 %390  ;;  %v386_v17 = vmul.f32 %v385_v8, %v379_v55  ;;  %v387_v18 = vmul.f32 %v385_v8, %v380_v60  ;;  %v486_v8 = vstv %s1028_s30  ;;  %v456_v9 = vadd.f32 %v455_v25, %v454_v23 }
 0x2a2   :  { %v395_v15 = vsel %vm394_vm8, %v391_v12, %v393_v24  ;;  %v396_v16 = vsel %vm394_vm8, %v393_v24, %v391_v12  ;;  %v358_v24 = vadd.f32 %v356_v11, %v325_v14  ;;  %v509_v11 = vrot.slane %v678_v46, %v1009_v7 }
 0x2a3   :  { %v410_v19 = vmul.f32 %v403_v62, %v396_v16  ;;  %v411_v21 = vmul.f32 %v407_v0, %v395_v15  ;;  %v388_v39 = vadd.f32 %v386_v17, %v357_v27  ;;  %v495_v62 = vpop.permute.xlu0 %494  ;;  %v547_v12 = vmul.f32 %v998_v61, %v546_v48 }
 0x2a4   :  { %v389_v42 = vadd.f32 %v387_v18, %v358_v24 }
 0x2a5   :  { %v417_v28 = vmul.f32 %v416_v1, %v410_v19  ;;  %v418_v29 = vmul.f32 %v416_v1, %v411_v21  ;;  %v431_v30 = vpop.permute.xlu1 %430 }
 0x2a6   :  { %v435_v31 = vsel %vm434_vm9, %v431_v30, %v433_v54  ;;  %v436_v33 = vsel %vm434_vm9, %v433_v54, %v431_v30  ;;  %v487_v54 = vadd.f32 %v486_v8, %v485_v35 }
 0x2a7   :  { %v419_v50 = vadd.f32 %v417_v28, %v388_v39  ;;  %v420_v4 = vadd.f32 %v418_v29, %v389_v42  ;;  %v450_v51 = vmul.f32 %v443_v63, %v435_v31  ;;  %v451_v52 = vmul.f32 %v447_v10, %v436_v33  ;;  %v679_v63 = vld [vmem:[%s1174_s5 + $0x10] ss:$8 sm:$0x3]  ;;  %v526_v20 = vpop.permute.xlu0 %525  ;;  %s797_s5 = smov [#allocation7]  }
 0x2a8   :  { %v518_v10 = vadd.f32 %v517_v2, %v516_v47  ;;  %v536_v19 = vrot.slane %v679_v63, %v897_v49  ;;  %v540_v21 = vrot.slane %v679_v63, %v1009_v7  ;;  %s638_s2 = sshll.u32 %s797_s5, 4  ;;  %s639_s2 = int_to_ptr.vmem [resolvable:$true] %s638_s2 }
 0x2a9   :  { %v462_v53 = vpop.permute.xlu1 %461  ;;  %v429_v38 = vadd.f32 %v1049_v32, %v420_v4  ;;  %v428_v13 = vadd.f32 %v1064_v45, %v419_v50  ;;  %v457_v14 = vmul.f32 %v456_v9, %v450_v51  ;;  %v458_v15 = vmul.f32 %v456_v9, %v451_v52  ;;  %s755_s3 = scalar_lea.vmem %s639_s2, 1024  ;;  %p760_p0 = scmp.lt.s32.totalorder %s639_s2, %s639_s2 }
 0x2aa   :  { %v466_v55 = vsel %vm465_vm10, %v462_v53, %v464_v26  ;;  %v467_v60 = vsel %vm465_vm10, %v464_v26, %v462_v53  ;;  %v549_v32 = vadd.f32 %v548_v3, %v547_v12  ;;  %p756_p13 = scmp.ne.s32.totalorder %s639_s2, %s755_s3  ;;  %p761_p1 = scmp.lt.s32.totalorder %s755_s3, %s755_s3 }
 0x2ab   :  { %v481_v0 = vmul.f32 %v474_v34, %v466_v55  ;;  %v482_v1 = vmul.f32 %v478_v43, %v467_v60  ;;  %v459_v45 = vadd.f32 %v457_v14, %v428_v13  ;;  %v460_v26 = vadd.f32 %v458_v15, %v429_v38 }
 0x2ac   :  { %p762_p2 = por %p761_p1, %p760_p0 }
 0x2ad   :  { %v493_v16 = vpop.permute.xlu1 %492  ;;  %v488_v22 = vmul.f32 %v487_v54, %v481_v0  ;;  %v489_v61 = vmul.f32 %v487_v54, %v482_v1 }
 0x2ae   :  { %v497_v17 = vsel %vm496_vm11, %v493_v16, %v495_v62  ;;  %v498_v18 = vsel %vm496_vm11, %v495_v62, %v493_v16  ;;  %v796_v62 = vmov 1966171168   ;;  %p763_p3 = pnand %p762_p2, %p756_p13 }
 0x2af   :  { %v512_v23 = vmul.f32 %v505_v6, %v497_v17  ;;  %v513_v25 = vmul.f32 %v509_v11, %v498_v18  ;;  %v490_v31 = vadd.f32 %v488_v22, %v459_v45  ;;  %v491_v33 = vadd.f32 %v489_v61, %v460_v26 }
 0x2b0   :  { %v576_v0 = vunpack.c.l.s4 %v796_v62 }
 0x2b1   :  { %v519_v27 = vmul.f32 %v518_v10, %v512_v23  ;;  %v520_v24 = vmul.f32 %v518_v10, %v513_v25  ;;  %v524_v28 = vpop.permute.xlu1 %523 }
 0x2b2   :  { %v528_v29 = vsel %vm527_vm12, %v524_v28, %v526_v20  ;;  %v529_v30 = vsel %vm527_vm12, %v526_v20, %v524_v28  ;;  %v577_v1 = vunpack.c.0.s8 %v576_v0 }
 0x2b3   :  { %v543_v34 = vmul.f32 %v536_v19, %v528_v29  ;;  %v544_v35 = vmul.f32 %v540_v21, %v529_v30  ;;  %v521_v39 = vadd.f32 %v519_v27, %v490_v31  ;;  %v522_v42 = vadd.f32 %v520_v24, %v491_v33 }
 0x2b4   :  { %v580_v11 = vsub.s32 %v577_v1, %v894_v44 }
 0x2b5   :  { %v550_v43 = vmul.f32 %v549_v32, %v543_v34  ;;  %v551_v8 = vmul.f32 %v549_v32, %v544_v35 }
 0x2b7   :  { %v552_v9 = vadd.f32 %v550_v43, %v521_v39  ;;  %v553_v46 = vadd.f32 %v551_v8, %v522_v42 }
 0x2b9   :  { %v556_v47 = vrot.slane %v552_v9, 2  ;;  %v557_v2 = vrot.slane %v553_v46, 2 }
 0x2bb   :  { %v560_v48 = vadd.f32 %v556_v47, %v552_v9  ;;  %v561_v50 = vadd.f32 %v557_v2, %v553_v46 }
 0x2bd   :  { %v562_v4 = vsub.f32 0.0, %v560_v48  ;;  %v563_v51 = vsub.f32 0.0, %v561_v50 }
 0x2bf   :  { %v564_v52 = vmul.f32 1.442695, %v562_v4  ;;  %v566_v53 = vmul.f32 1.442695, %v563_v51 }
 0x2c1   :  { %713 = vpow2.f32 %v564_v52 }
 0x2c2   :  { %715 = vpow2.f32 %v566_v53 }
 0x2cb   :  { %v714_v5 = vpop.eup %713 }
 0x2cc   :  { %v716_v54 = vpop.eup %715  ;;  %v568_v55 = vadd.f32 1.0, %v714_v5 }
 0x2cd   :  { %v569_v60 = vadd.f32 1.0, %v716_v54 }
 0x2ce   :  { %717 = vrcp.f32 %v568_v55 }
 0x2cf   :  { %719 = vrcp.f32 %v569_v60 }
 0x2d8   :  { %v718_v6 = vpop.eup %717 }
 0x2d9   :  { %v720_v63 = vpop.eup %719 }
 0x2da   :  { %v574_v10 = vcombine.low %v718_v6, %v720_v63 }
 0x2dc   :  { %v581_v12 = vrot.slane %v574_v10, %v580_v11 }
 0x2de   :  { %v582_v3 = vcombine.high %v581_v12, %v581_v12  ;;  %v589_v38 = vrot.slane %v581_v12, %v580_v11 }
 0x2e0   :  { %v596_v13 = vrot.slane %v582_v3, %v580_v11  ;;  %v600_v14 = vrot.slane %v589_v38, %v897_v49  ;;  %v604_v15 = vrot.slane %v589_v38, %v1009_v7 }
 0x2e2   :  { %v608_v16 = vrot.slane %v596_v13, %v897_v49  ;;  %v612_v17 = vrot.slane %v596_v13, %v1009_v7  ;;  %v617_v18 = vmul.f32 %v600_v14, %v924_v40  ;;  %v618_v44 = vmul.f32 %v604_v15, %v927_v41 }
 0x2e3   :  { %v619_v19 = vmul.f32 %v600_v14, %v918_v36  ;;  %v620_v21 = vmul.f32 %v604_v15, %v921_v37 }
 0x2e4   :  { %v621_v22 = vmul.f32 %v608_v16, %v938_v56  ;;  %v622_v61 = vmul.f32 %v612_v17, %v941_v57  ;;  %v623_v23 = vmul.f32 %v608_v16, %v944_v58  ;;  %v624_v25 = vmul.f32 %v612_v17, %v947_v59  ;;  %625 = vst [vmem:[#allocation7] sm:$0xff] %v617_v18 }
 0x2e5   :  { %626 = vst [vmem:[#allocation7 + $0x8] sm:$0xff] %v618_v44  ;;  %627 = vst [vmem:[#allocation7 + $0x10] sm:$0xff] %v619_v19 }
 0x2e6   :  { %628 = vst [vmem:[#allocation7 + $0x18] sm:$0xff] %v620_v21  ;;  %629 = vst [vmem:[#allocation7 + $0x20] sm:$0xff] %v621_v22 }
 0x2e7   :  { %630 = vst [vmem:[#allocation7 + $0x28] sm:$0xff] %v622_v61  ;;  %631 = vst [vmem:[#allocation7 + $0x30] sm:$0xff] %v623_v23 }
 0x2e8   :  { %632 = vst [vmem:[#allocation7 + $0x38] sm:$0xff] %v624_v25 }
 0x2e9   :  { %766 = shalt.err (!%p763_p3)
}
 0x2ea   :  { %s767_s4 = scalar_lea.hbm %s1176_s7, 1024 }
 0x2eb   :  { %p768_p4 = scmp.ne.s32.totalorder %s1176_s7, %s767_s4  ;;  %p771_p5 = scmp.lt.u32.totalorder %s767_s4, %s1176_s7 }
 0x2ed   :  { %p773_p6 = pnand %p771_p5, %p768_p4 }
 0x2ef   :  { %776 = shalt.err (!%p773_p6)
}
 0x2f0   :  { %644 = dma.vmem_to_hbm [thread:$0]  %s639_s2, 1024, %s1176_s7, [#allocation4], %s784_s6, %s784_s6, %s785_s14  }
 0x2f1   :  { %781 = dma.done.wait [#allocation4], 1024  }
 0x2f2   :  { %782 = vsyncadd [#allocation4], 4294966272 }
 0x2f3   :  { %648 = vsyncpa [#allocation3], 1 }
 0x2f4   :  { %649 = vsyncpa [#allocation4], 1 }
 0x2f5   :  { %650 = vsyncpa [#allocation5], 1 }

</bundles_post_ra>
